<compile_context>
chip_gen: v6e
topology: v6e:2x2x1
jax: 0.10.0
libtpu: 0.0.40
codegen_flags: <defaults>
</compile_context>

<pallas_src>
import numpy as np
import jax
import jax.numpy as jnp
from jax.experimental import pallas as pl
from jax.experimental.pallas import tpu as pltpu

# ---------------- configuration ----------------
B, T = 2, 8
D_MODEL = 32
L_WING = 16          # wing feature length (conv1d_feat, no input channels)
C_HID = 4            # ResNet1d hidden channels
F_VEL = 8            # 'fc' branch input size
KSIZE = 3
CL = C_HID * L_WING  # 64
INPUT_IDX = {"vel": (0, F_VEL), "wing": (F_VEL, F_VEL + L_WING)}
INPUT_SZS = {"vel": (F_VEL,), "wing": (L_WING,)}
F_TOTAL = F_VEL + L_WING          # 24
MBIG_COLS = 2 * CL + D_MODEL      # 160
BIAS_COLS = MBIG_COLS + CL        # 224


# ---------------- Pallas kernel ----------------
def obs_embedding_kernel(x_ref, mbig_ref, m2_ref, wfc_ref, bias_ref, out_ref):
    x = x_ref[...]                                   # (TM, 24)
    bbig = bias_ref[:, :MBIG_COLS]                   # (1, 160)
    b2 = bias_ref[:, MBIG_COLS:BIAS_COLS]            # (1, 64)

    # One fused matmul: [conv1+BN | downsample+BN | vel Linear (+ head biases)]
    y = jnp.dot(x, mbig_ref[...], preferred_element_type=jnp.float32) + bbig

    h1 = jnp.maximum(y[:, :CL], 0.0)                 # conv1 + BN + ReLU   (TM, 64)
    idn = y[:, CL:2 * CL]                            # downsample path     (TM, 64)
    vel = y[:, 2 * CL:MBIG_COLS]                     # vel Linear + bhead  (TM, 32)

    # conv2 (k=3,'same') + BN (folded into M2 / b2), residual add, ReLU
    h2 = jnp.dot(h1, m2_ref[...], preferred_element_type=jnp.float32) + b2
    r = jnp.maximum(h2 + idn, 0.0)

    # ResNet1d head Linear(C*L -> d_model); vel branch + biases already in `vel`.
    out_ref[...] = jnp.dot(r, wfc_ref[...], preferred_element_type=jnp.float32) + vel


def _choose_row_tiling(n):
    """Pick (TM, N_pad): single sublane-aligned tile for small N, TM=256 tiles for big N."""
    if n <= 512:
        tm = max(8, ((n + 7) // 8) * 8)
        return tm, tm
    tm = 256
    n_pad = ((n + tm - 1) // tm) * tm
    return tm, n_pad


def obs_embedding_forward(src, params):
    """src: (B, T, F_TOTAL) float32 -> (B, T, D_MODEL) float32."""
    b, t, f = src.shape
    n = b * t
    x = src.reshape(n, f)                            # free view, features -> lanes

    tm, n_pad = _choose_row_tiling(n)
    if n_pad != n:
        x = jnp.pad(x, ((0, n_pad - n), (0, 0)))
    grid = (n_pad // tm,)

    weights = (params["Mbig"], params["M2"], params["Wfc"], params["bias_all"])
    args = (x,) + weights

    in_specs = [pl.BlockSpec((tm, F_TOTAL), lambda i: (i, 0))]
    in_specs += [pl.BlockSpec(w.shape, lambda i: (0, 0)) for w in weights]

    flops = 2 * n_pad * (F_TOTAL * MBIG_COLS + CL * CL + CL * D_MODEL)
    bytes_accessed = 4 * (sum(int(np.prod(a.shape)) for a in args) + n_pad * D_MODEL)

    out = pl.pallas_call(
        obs_embedding_kernel,
        out_shape=jax.ShapeDtypeStruct((n_pad, D_MODEL), jnp.float32),
        grid=grid,
        in_specs=in_specs,
        out_specs=pl.BlockSpec((tm, D_MODEL), lambda i: (i, 0)),
        cost_estimate=pl.CostEstimate(flops=flops, transcendentals=0,
                                      bytes_accessed=bytes_accessed),
        compiler_params=pltpu.CompilerParams(
            dimension_semantics=("parallel",)),
    )(*args)
    return out[:n].reshape(b, t, D_MODEL)


# ---------------- deterministic parameter construction ----------------
def build_params(key):
    rngs = jax.random.split(key, 12)

    def rnd(i, shape, scale=0.1):
        return np.asarray(jax.random.normal(rngs[i], shape, dtype=jnp.float32)) * scale

    # raw PyTorch-style parameters
    w1 = rnd(0, (C_HID, 1, KSIZE));      cb1 = rnd(1, (C_HID,))
    w2 = rnd(2, (C_HID, C_HID, KSIZE));  cb2 = rnd(3, (C_HID,))
    wd = rnd(4, (C_HID, 1, 1))           # downsample conv, bias=False

    def bn(i):
        gamma = 1.0 + 0.1 * np.arange(C_HID, dtype=np.float32)
        beta = 0.05 * np.arange(C_HID, dtype=np.float32)
        mean = rnd(i, (C_HID,))
        var = 1.0 + 0.2 * np.arange(C_HID, dtype=np.float32)
        eps = 1e-5
        scale = gamma / np.sqrt(var + eps)
        shift = beta - mean * scale
        return scale.astype(np.float32), shift.astype(np.float32)

    s1, t1 = bn(5)
    s2, t2 = bn(6)
    sd, td = bn(7)

    wfc = rnd(8, (D_MODEL, CL));   bfc = rnd(9, (D_MODEL,))
    wlin = rnd(10, (D_MODEL, F_VEL)); blin = rnd(11, (D_MODEL,))

    L, C, pad = L_WING, C_HID, KSIZE // 2

    # conv1 (C_in=1) + BN folded: (L) -> (C*L), flatten order c*L + l
    M1 = np.zeros((L, C * L), np.float32)
    b1 = np.zeros((1, C * L), np.float32)
    for co in range(C):
        for lo in range(L):
            for k in range(KSIZE):
                li = lo + k - pad
                if 0 <= li < L:
                    M1[li, co * L + lo] += s1[co] * w1[co, 0, k]
        b1[0, co * L:(co + 1) * L] = s1[co] * cb1[co] + t1[co]

    # conv2 (C_in=C) + BN folded: (C*L) -> (C*L)
    M2 = np.zeros((C * L, C * L), np.float32)
    b2 = np.zeros((1, C * L), np.float32)
    for co in range(C):
        for ci in range(C):
            for lo in range(L):
                for k in range(KSIZE):
                    li = lo + k - pad
                    if 0 <= li < L:
                        M2[ci * L + li, co * L + lo] += s2[co] * w2[co, ci, k]
        b2[0, co * L:(co + 1) * L] = s2[co] * cb2[co] + t2[co]

    # downsample 1x1 conv (no bias) + BN folded: (L) -> (C*L)
    Md = np.zeros((L, C * L), np.float32)
    bd = np.zeros((1, C * L), np.float32)
    for co in range(C):
        for lo in range(L):
            Md[lo, co * L + lo] = sd[co] * wd[co, 0, 0]
        bd[0, co * L:(co + 1) * L] = td[co]

    # ---- host-side fusion (perf review) ----
    # Mbig (24, 160): wing rows 8..23 -> lanes 0..127 = [M1 | Md];
    #                 vel  rows 0..7  -> lanes 128..159 = Wlin^T.
    Mbig = np.zeros((F_TOTAL, MBIG_COLS), np.float32)
    Mbig[F_VEL:F_TOTAL, 0:CL] = M1
    Mbig[F_VEL:F_TOTAL, CL:2 * CL] = Md
    Mbig[0:F_VEL, 2 * CL:MBIG_COLS] = wlin.T

    bhead = (bfc + blin).reshape(1, -1)                     # pre-summed head biases
    bbig = np.concatenate([b1, bd, bhead], axis=1)          # (1, 160)
    bias_all = np.concatenate([bbig, b2], axis=1)           # (1, 224): single bias operand

    params = dict(
        Mbig=jnp.asarray(Mbig),
        M2=jnp.asarray(M2),
        Wfc=jnp.asarray(wfc.T.copy()),
        bias_all=jnp.asarray(bias_all),
    )
    raw = dict(w1=w1, cb1=cb1, s1=s1, t1=t1,
               w2=w2, cb2=cb2, s2=s2, t2=t2,
               wd=wd, sd=sd, td=td,
               wfc=wfc, bfc=bfc, wlin=wlin, blin=blin)
    return params, raw


# ---------------- pure numpy reference (explicit convs, eval-mode BN) ----------------
def reference_forward(src_np, raw):
    n = B * T
    vel = src_np[..., INPUT_IDX["vel"][0]:INPUT_IDX["vel"][1]].reshape(n, F_VEL)
    wing = src_np[..., INPUT_IDX["wing"][0]:INPUT_IDX["wing"][1]].reshape(n, 1, L_WING)

    def conv1d_same(x, w, b):
        N, Ci, L = x.shape
        Co = w.shape[0]
        xp = np.pad(x, ((0, 0), (0, 0), (1, 1)))
        out = np.zeros((N, Co, L), np.float32)
        for co in range(Co):
            for ci in range(Ci):
                for k in range(KSIZE):
                    out[:, co, :] += w[co, ci, k] * xp[:, ci, k:k + L]
            if b is not None:
                out[:, co, :] += b[co]
        return out

    def bn_apply(x, scale, shift):
        return x * scale[None, :, None] + shift[None, :, None]

    h1 = np.maximum(bn_apply(conv1d_same(wing, raw["w1"], raw["cb1"]), raw["s1"], raw["t1"]), 0.0)
    h2 = bn_apply(conv1d_same(h1, raw["w2"], raw["cb2"]), raw["s2"], raw["t2"])
    # downsample: exact 1x1 conv (no bias) + BN
    idn = bn_apply(raw["wd"][:, 0, 0][None, :, None] * wing, raw["sd"], raw["td"])
    r = np.maximum(h2 + idn, 0.0)
    wing_out = r.reshape(n, C_HID * L_WING) @ raw["wfc"].T + raw["bfc"]
    vel_out = vel @ raw["wlin"].T + raw["blin"]
    return (wing_out + vel_out).reshape(B, T, D_MODEL)


if __name__ == "__main__":
    key = jax.random.PRNGKey(0)
    k_src, k_par = jax.random.split(key)
    src = jax.random.normal(k_src, (B, T, F_TOTAL), dtype=jnp.float32)

    params, raw = build_params(k_par)

    out = obs_embedding_forward(src, params)
    out = jax.block_until_ready(out)

    ref = reference_forward(np.asarray(src), raw)
    assert out.shape == (B, T, D_MODEL)
    np.testing.assert_allclose(np.asarray(out), ref, rtol=1e-4, atol=2e-4)

    print("KERNEL_OK")
</pallas_src>

<mosaic_0001>
module attributes {stable_mosaic.version = 11 : i64} {
  func.func @obs_embedding_kernel(%arg0: i32, %arg1: memref<16x24xf32, #tpu.memory_space<vmem>>, %arg2: memref<24x160xf32, #tpu.memory_space<vmem>>, %arg3: memref<64x64xf32, #tpu.memory_space<vmem>>, %arg4: memref<64x32xf32, #tpu.memory_space<vmem>>, %arg5: memref<1x224xf32, #tpu.memory_space<vmem>>, %arg6: memref<16x32xf32, #tpu.memory_space<vmem>>) attributes {dimension_semantics = [#tpu.dimension_semantics<parallel>], iteration_bounds = array<i64: 1>, scalar_prefetch = 0 : i64, scratch_operands = 0 : i64, tpu.core_type = #tpu.core_type<tc>, window_params = [{transform_indices = @transform_0, window_bounds = array<i64: 16, 24>}, {pipeline_mode = #tpu.pipeline_mode<synchronous>, transform_indices = @transform_1, window_bounds = array<i64: 24, 160>}, {pipeline_mode = #tpu.pipeline_mode<synchronous>, transform_indices = @transform_2, window_bounds = array<i64: 64, 64>}, {pipeline_mode = #tpu.pipeline_mode<synchronous>, transform_indices = @transform_3, window_bounds = array<i64: 64, 32>}, {pipeline_mode = #tpu.pipeline_mode<synchronous>, transform_indices = @transform_4, window_bounds = array<i64: 1, 224>}, {transform_indices = @transform_5, window_bounds = array<i64: 16, 32>}]} {
    %c0 = arith.constant 0 : index
    %c0_0 = arith.constant 0 : index
    %0 = vector.load %arg1[%c0, %c0_0] : memref<16x24xf32, #tpu.memory_space<vmem>>, vector<16x24xf32>
    %c0_1 = arith.constant 0 : index
    %c0_2 = arith.constant 0 : index
    %1 = vector.load %arg5[%c0_1, %c0_2] : memref<1x224xf32, #tpu.memory_space<vmem>>, vector<1x160xf32>
    %c0_3 = arith.constant 0 : index
    %c160 = arith.constant 160 : index
    %2 = vector.load %arg5[%c0_3, %c160] : memref<1x224xf32, #tpu.memory_space<vmem>>, vector<1x64xf32>
    %c0_4 = arith.constant 0 : index
    %c0_5 = arith.constant 0 : index
    %3 = vector.load %arg2[%c0_4, %c0_5] : memref<24x160xf32, #tpu.memory_space<vmem>>, vector<24x160xf32>
    %cst = arith.constant dense<0.000000e+00> : vector<16x160xf32>
    %4 = tpu.matmul %0, %3, %cst {dimension_numbers = #tpu.dot_dimension_numbers<[1], [0], [0], [1], [0, 0, 1, 1], [], []>} : vector<16x24xf32>, vector<24x160xf32>, vector<16x160xf32> -> vector<16x160xf32>
    %5 = vector.broadcast %1 : vector<1x160xf32> to vector<16x160xf32>
    %6 = arith.addf %4, %5 : vector<16x160xf32>
    %7 = vector.extract_strided_slice %6 {offsets = [0, 0], sizes = [16, 64], strides = [1, 1]} : vector<16x160xf32> to vector<16x64xf32>
    %cst_6 = arith.constant 0.000000e+00 : f32
    %8 = vector.broadcast %cst_6 : f32 to vector<16x64xf32>
    %9 = arith.maximumf %7, %8 : vector<16x64xf32>
    %10 = vector.extract_strided_slice %6 {offsets = [0, 64], sizes = [16, 64], strides = [1, 1]} : vector<16x160xf32> to vector<16x64xf32>
    %11 = vector.extract_strided_slice %6 {offsets = [0, 128], sizes = [16, 32], strides = [1, 1]} : vector<16x160xf32> to vector<16x32xf32>
    %c0_7 = arith.constant 0 : index
    %c0_8 = arith.constant 0 : index
    %12 = vector.load %arg3[%c0_7, %c0_8] : memref<64x64xf32, #tpu.memory_space<vmem>>, vector<64x64xf32>
    %cst_9 = arith.constant dense<0.000000e+00> : vector<16x64xf32>
    %13 = tpu.matmul %9, %12, %cst_9 {dimension_numbers = #tpu.dot_dimension_numbers<[1], [0], [0], [1], [0, 0, 1, 1], [], []>} : vector<16x64xf32>, vector<64x64xf32>, vector<16x64xf32> -> vector<16x64xf32>
    %14 = vector.broadcast %2 : vector<1x64xf32> to vector<16x64xf32>
    %15 = arith.addf %13, %14 : vector<16x64xf32>
    %16 = arith.addf %15, %10 : vector<16x64xf32>
    %cst_10 = arith.constant 0.000000e+00 : f32
    %17 = vector.broadcast %cst_10 : f32 to vector<16x64xf32>
    %18 = arith.maximumf %16, %17 : vector<16x64xf32>
    %c0_11 = arith.constant 0 : index
    %c0_12 = arith.constant 0 : index
    %19 = vector.load %arg4[%c0_11, %c0_12] : memref<64x32xf32, #tpu.memory_space<vmem>>, vector<64x32xf32>
    %cst_13 = arith.constant dense<0.000000e+00> : vector<16x32xf32>
    %20 = tpu.matmul %18, %19, %cst_13 {dimension_numbers = #tpu.dot_dimension_numbers<[1], [0], [0], [1], [0, 0, 1, 1], [], []>} : vector<16x64xf32>, vector<64x32xf32>, vector<16x32xf32> -> vector<16x32xf32>
    %21 = arith.addf %20, %11 : vector<16x32xf32>
    %c0_14 = arith.constant 0 : index
    %c0_15 = arith.constant 0 : index
    %22 = vector.load %arg6[%c0_14, %c0_15] : memref<16x32xf32, #tpu.memory_space<vmem>>, vector<16x32xf32>
    tpu.vector_store %arg6[%c0_14, %c0_15], %21 {strides = array<i32>} : memref<16x32xf32, #tpu.memory_space<vmem>>, vector<16x32xf32>,
    return
  }
  func.func @transform_0(%arg0: i32) -> (i32, i32) {
    %c0_i32 = arith.constant 0 : i32
    %c0_i32_0 = arith.constant 0 : i32
    return %arg0, %c0_i32 : i32, i32
  }
  func.func @transform_1(%arg0: i32) -> (i32, i32) {
    %c0_i32 = arith.constant 0 : i32
    %c0_i32_0 = arith.constant 0 : i32
    %c0_i32_1 = arith.constant 0 : i32
    return %c0_i32, %c0_i32_0 : i32, i32
  }
  func.func @transform_2(%arg0: i32) -> (i32, i32) {
    %c0_i32 = arith.constant 0 : i32
    %c0_i32_0 = arith.constant 0 : i32
    %c0_i32_1 = arith.constant 0 : i32
    return %c0_i32, %c0_i32_0 : i32, i32
  }
  func.func @transform_3(%arg0: i32) -> (i32, i32) {
    %c0_i32 = arith.constant 0 : i32
    %c0_i32_0 = arith.constant 0 : i32
    %c0_i32_1 = arith.constant 0 : i32
    return %c0_i32, %c0_i32_0 : i32, i32
  }
  func.func @transform_4(%arg0: i32) -> (i32, i32) {
    %c0_i32 = arith.constant 0 : i32
    %c0_i32_0 = arith.constant 0 : i32
    %c0_i32_1 = arith.constant 0 : i32
    return %c0_i32, %c0_i32_0 : i32, i32
  }
  func.func @transform_5(%arg0: i32) -> (i32, i32) {
    %c0_i32 = arith.constant 0 : i32
    %c0_i32_0 = arith.constant 0 : i32
    return %arg0, %c0_i32 : i32, i32
  }
}

</mosaic_0001>

<bundles_post_ra>
// kernel: tpu_custom_call.1
= control target key start
LH: loop header
LB: loop body
LE: loop exit
PB: predicated region body
PF: predicated region fallthrough
CT: control target
= control target key end

     0   :  { %10 = vsyncpa [#allocation3], 0  ;;  %s590_s0 = inlined_call_operand.vmem [shape: f32[16,24], index: 0, kind: input, shape index: {}]   ;;  %s591_s1 = inlined_call_operand.hbm [shape: f32[24,160], index: 1, kind: input, shape index: {}]   ;;  %s592_s2 = inlined_call_operand.vmem [shape: f32[64,64], index: 2, kind: input, shape index: {}]   ;;  %s593_s3 = inlined_call_operand.vmem [shape: f32[64,32], index: 3, kind: input, shape index: {}]   ;;  %s594_s4 = inlined_call_operand.vmem [shape: f32[1,224], index: 4, kind: input, shape index: {}]   ;;  %s595_s5 = inlined_call_operand.hbm [shape: f32[16,32], index: 5, kind: output, shape index: {}]  }
   0x1   :  { %11 = vsyncpa [#allocation4], 0  ;;  %s479_s18 = smov [#allocation2]  }
   0x2   :  { %s19_s19 = sshll.u32 %s479_s18, 4  ;;  %s20_s19 = int_to_ptr.vmem [resolvable:$true] %s19_s19 }
   0x3   :  { %s443_s20 = scalar_lea.vmem %s20_s19, 768  ;;  %p448_p1 = scmp.lt.s32.totalorder %s20_s19, %s20_s19 }
   0x4   :  { %p444_p0 = scmp.ne.s32.totalorder %s20_s19, %s443_s20  ;;  %p449_p2 = scmp.lt.s32.totalorder %s443_s20, %s443_s20 }
   0x6   :  { %p450_p3 = por %p449_p2, %p448_p1 }
   0x8   :  { %p451_p4 = pnand %p450_p3, %p444_p0 }
   0xa   :  { %454 = shalt.err (!%p451_p4)
}
   0xb   :  { %s480_s21 = smov 256   ;;  %s481_s22 = smov 16  }
   0xc   :  { %25 = dma.hbm_to_vmem [thread:$0]  %s591_s1, 768, %s20_s19, [#allocation3], %s480_s21, %s480_s21, %s481_s22  }
   0xd   :  { %475 = dma.done.wait [#allocation3], 768  }
   0xe   :  { %476 = vsyncadd [#allocation3], 4294966528  ;;  %v482_v0 = vmov 0.0   ;;  %v44_v1 = vld [vmem:[#allocation2 + $0x28] sm:$0xff]  ;;  %v43_v2 = vld [vmem:[#allocation2 + $0x20] sm:$0xff]  ;;  %vm56_vm0 = vcmask 195584   ;;  %v46_v18 = vlaneseq }
   0xf   :  { %127 = vmatprep.mubr.f32.mxu0 %v482_v0  ;;  %v42_v3 = vld [vmem:[#allocation2 + $0x18] sm:$0xff]  ;;  %89 = vmatprep.subr.mxu0 %v44_v1  ;;  %v41_v4 = vld [vmem:[#allocation2 + $0x10] sm:$0xff]  ;;  %v40_v5 = vld [vmem:[#allocation2 + $0x8] sm:$0xff]  ;;  %s483_s13 = smov 96   ;;  %vm158_vm1 = vcmask 523264   ;;  %s484_s1 = smov 64  }
  0x10   :  { %90 = vmatpush1.msra.mxu0 %v43_v2  ;;  %v149_v6 = vld [vmem:[%s592_s2 + $0x38] sm:$0xff]  ;;  %v39_v7 = vld [vmem:[#allocation2] sm:$0xff]  ;;  %v148_v8 = vld [vmem:[%s592_s2 + $0x30] sm:$0xff]  ;;  %v47_v19 = vshrl.u32 %v46_v18, 7  ;;  %vm341_vm2 = vcmask 261120  }
  0x11   :  { %91 = vmatprep.subr.mxu0 %v42_v3  ;;  %388 = vmatprep.subr.mxu1 %v149_v6  ;;  %v35_v9 = vld [vmem:[%s590_s0] sm:$0xff]  ;;  %v147_v10 = vld [vmem:[%s592_s2 + $0x28] sm:$0xff]  ;;  %v145_v14 = vld [vmem:[%s592_s2 + $0x18] sm:$0xff] }
  0x12   :  { %92 = vmatpush1.msra.mxu0 %v41_v4  ;;  %389 = vmatpush3.msra.mxu1 %v149_v6  ;;  %v146_v11 = vld [vmem:[%s592_s2 + $0x20] sm:$0xff]  ;;  %v36_v13 = vld [vmem:[%s590_s0 + $0x8] sm:$0xff]  ;;  %v144_v15 = vld [vmem:[%s592_s2 + $0x10] sm:$0xff]  ;;  %v48_v20 = vsub.s32 0, %v47_v19  ;;  %v52_v49 = vsub.s32 1, %v47_v19 }
  0x13   :  { %93 = vmatprep.subr.mxu0 %v40_v5  ;;  %390 = vmatprep.subr.mxu1 %v148_v8  ;;  %v363_v12 = vld [vmem:[%s594_s4 + $0x1] ss:$0 sm:$0xff]  ;;  %v143_v16 = vld [vmem:[%s592_s2 + $0x8] sm:$0xff]  ;;  %v259_v21 = vld [vmem:[%s593_s3 + $0x38] sm:$0xff] }
  0x14   :  { %94 = vmatpush1.msra.mxu0 %v39_v7  ;;  %391 = vmatpush3.msra.mxu1 %v148_v8  ;;  %v142_v17 = vld [vmem:[%s592_s2] sm:$0xff]  ;;  %v258_v22 = vld [vmem:[%s593_s3 + $0x30] sm:$0xff]  ;;  %v257_v24 = vld [vmem:[%s593_s3 + $0x28] sm:$0xff] }
  0x15   :  { %361 = vmatmul.mubr.msk.f32.vlgmr.msra.gmra.mxu0 %vm56_vm0, %v35_v9  ;;  %392 = vmatprep.subr.mxu1 %v147_v10  ;;  %v37_v23 = vld [vmem:[%s594_s4] sm:$0x3]  ;;  %v255_v34 = vld [vmem:[%s593_s3 + $0x18] sm:$0xff]  ;;  %v254_v35 = vld [vmem:[%s593_s3 + $0x10] sm:$0xff] }
  0x16   :  { %133 = vmatprep.mubr.f32.mxu0 %v482_v0  ;;  %393 = vmatpush3.msra.mxu1 %v147_v10  ;;  %v49_v25 = vrot.slane %v37_v23, %v48_v20  ;;  %v256_v33 = vld [vmem:[%s593_s3 + $0x20] sm:$0xff]  ;;  %v253_v36 = vld [vmem:[%s593_s3 + $0x8] sm:$0xff]  ;;  %v53_v51 = vrot.slane %v37_v23, %v52_v49 }
  0x17   :  { %394 = vmatprep.subr.mxu1 %v146_v11  ;;  %155 = vrot.lane.b32.xlu0 %v363_v12, %s483_s13  ;;  %v252_v37 = vld [vmem:[%s593_s3] sm:$0xff]  ;;  %s485_s3 = smov [#allocation5]  }
  0x18   :  { %395 = vmatpush3.msra.mxu1 %v146_v11  ;;  %407 = vmatprep.subr.mxu0 %v259_v21  ;;  %s349_s12 = sshll.u32 %s485_s3, 4  ;;  %s350_s12 = int_to_ptr.vmem [resolvable:$true] %s349_s12 }
  0x19   :  { %362 = vmatmul.mubr.msk.f32.gmra.mxu0 %vm56_vm0, %v36_v13  ;;  %396 = vmatprep.subr.mxu1 %v145_v14  ;;  %s455_s13 = scalar_lea.vmem %s350_s12, 256  ;;  %p460_p6 = scmp.lt.s32.totalorder %s350_s12, %s350_s12 }
  0x1a   :  { %397 = vmatpush3.msra.mxu1 %v145_v14  ;;  %408 = vmatpush3.msra.mxu0 %v259_v21  ;;  %p456_p5 = scmp.ne.s32.totalorder %s350_s12, %s455_s13  ;;  %p461_p7 = scmp.lt.s32.totalorder %s455_s13, %s455_s13 }
  0x1b   :  { %398 = vmatprep.subr.mxu1 %v144_v15  ;;  %409 = vmatprep.subr.mxu0 %v258_v22 }
  0x1c   :  { %399 = vmatpush3.msra.mxu1 %v144_v15  ;;  %410 = vmatpush3.msra.mxu0 %v258_v22  ;;  %p462_p8 = por %p461_p7, %p460_p6 }
  0x1d   :  { %400 = vmatprep.subr.mxu1 %v143_v16  ;;  %411 = vmatprep.subr.mxu0 %v257_v24 }
  0x1e   :  { %401 = vmatpush3.msra.mxu1 %v143_v16  ;;  %412 = vmatpush3.msra.mxu0 %v257_v24  ;;  %p463_p9 = pnand %p462_p8, %p456_p5 }
  0x1f   :  { %402 = vmatprep.subr.mxu1 %v142_v17  ;;  %413 = vmatprep.subr.mxu0 %v256_v33 }
  0x20   :  { %403 = vmatpush3.msra.mxu1 %v142_v17  ;;  %414 = vmatpush3.msra.mxu0 %v256_v33 }
  0x21   :  { %415 = vmatprep.subr.mxu0 %v255_v34 }
  0x22   :  { %416 = vmatpush3.msra.mxu0 %v255_v34 }
  0x23   :  { %417 = vmatprep.subr.mxu0 %v254_v35 }
  0x24   :  { %418 = vmatpush3.msra.mxu0 %v254_v35 }
  0x25   :  { %419 = vmatprep.subr.mxu0 %v253_v36 }
  0x26   :  { %420 = vmatpush3.msra.mxu0 %v253_v36 }
  0x27   :  { %421 = vmatprep.subr.mxu0 %v252_v37 }
  0x28   :  { %422 = vmatpush3.msra.mxu0 %v252_v37 }
  0x89   :  { %v156_v38 = vpop.permute.xlu0 %155 }
  0xd5   :  { %v129_v26 = vpop.f32.mrf.mxu0 }
  0xd6   :  { %v130_v27 = vadd.f32 %v129_v26, %v49_v25 }
  0xd7   :  { %v131_v28 = vpop.f32.mrf.mxu0 }
  0xd8   :  { %242 = vrot.lane.b32.xlu0 %v130_v27, %s484_s1  ;;  %v140_v29 = vmax.f32 %v130_v27, 0.0  ;;  %v132_v54 = vadd.f32 %v131_v28, %v53_v51 }
  0xd9   :  { %v135_v30 = vpop.f32.mrf.mxu0 }
  0xda   :  { %v136_v31 = vadd.f32 %v135_v30, %v49_v25  ;;  %404 = vmatprep.mubr.msk.f32.mxu1 %vm158_vm1, %v140_v29 }
  0xdb   :  { %v137_v50 = vpop.f32.mrf.mxu0 }
  0xdc   :  { %v141_v32 = vmax.f32 %v136_v31, 0.0  ;;  %244 = vrot.lane.b32.xlu1 %v136_v31, %s484_s1  ;;  %v138_v52 = vadd.f32 %v137_v50, %v53_v51 }
  0xde   :  { %405 = vmatmul.mubr.msk.f32.vlgmr.msra.gmra.mxu1 %vm158_vm1, %v141_v32 }
 0x14a   :  { %v243_v44 = vpop.permute.xlu0 %242 }
 0x14e   :  { %v245_v42 = vpop.permute.xlu1 %244 }
 0x19e   :  { %v406_v39 = vpop.f32.mrf.mxu1 }
 0x19f   :  { %v237_v40 = vadd.f32 %v406_v39, %v156_v38 }
 0x1a0   :  { %v231_v41 = vpop.f32.mrf.mxu1 }
 0x1a1   :  { %v232_v43 = vadd.f32 %v231_v41, %v156_v38  ;;  %v249_v45 = vadd.f32 %v245_v42, %v237_v40 }
 0x1a3   :  { %v248_v46 = vadd.f32 %v243_v44, %v232_v43  ;;  %v251_v48 = vmax.f32 %v249_v45, 0.0 }
 0x1a5   :  { %v250_v47 = vmax.f32 %v248_v46, 0.0 }
 0x1a7   :  { %423 = vmatprep.mubr.msk.f32.mxu0 %vm158_vm1, %v250_v47 }
 0x1a8   :  { %424 = vmatmul.mubr.msk.f32.vlgmr.msra.gmra.mxu0 %vm158_vm1, %v251_v48 }
 0x268   :  { %v425_v53 = vpop.f32.mrf.mxu0 }
 0x269   :  { %v338_v55 = vadd.f32 %v425_v53, %v138_v52 }
 0x26a   :  { %v332_v56 = vpop.f32.mrf.mxu0 }
 0x26b   :  { %343 = vst.msk [vmem:[#allocation5 + $0x8] sm:$0xff] %vm341_vm2, %v338_v55  ;;  %v333_v57 = vadd.f32 %v332_v56, %v132_v54 }
 0x26d   :  { %342 = vst.msk [vmem:[#allocation5] sm:$0xff] %vm341_vm2, %v333_v57 }
 0x26e   :  { %466 = shalt.err (!%p463_p9)
}
 0x26f   :  { %s486_s14 = smov 128   ;;  %s487_s15 = smov 8  }
 0x270   :  { %355 = dma.vmem_to_hbm [thread:$0]  %s350_s12, 256, %s595_s5, [#allocation4], %s486_s14, %s486_s14, %s487_s15  }
 0x271   :  { %477 = dma.done.wait [#allocation4], 256  }
 0x272   :  { %478 = vsyncadd [#allocation4], 4294967040 }
 0x273   :  { %359 = vsyncpa [#allocation3], 1 }
 0x274   :  { %360 = vsyncpa [#allocation4], 1 }

</bundles_post_ra>
